<compile_context>
chip_gen: v7x
topology: tpu7x:2x2x1
jax: 0.10.0
libtpu: 0.0.40
codegen_flags: <defaults>
</compile_context>

<pallas_src>
import functools

import jax
import jax.numpy as jnp
from jax import lax
from jax.experimental import pallas as pl
from jax.experimental.pallas import tpu as pltpu


LANE = 128
SUBLANE = 8


def _round_up(v, m):
    return (v + m - 1) // m * m


def _pad_to_shape(x, shape):
    pads = tuple((0, t - s) for s, t in zip(x.shape, shape))
    if any(p for _, p in pads):
        x = jnp.pad(x, pads)
    return x


def neural_fingerprint_kernel(feat_ref, adj_ref,
                              wemb_ref, bemb_ref,
                              wh_ref, bh_ref,
                              wfp_ref, bfp_ref,
                              wcl_ref, bcl_ref,
                              out_ref, *, R, n_valid, l_valid, c_valid,
                              approx_recip):
    cdtype = wemb_ref.dtype           # matmul operand dtype (f32 or bf16)

    feat = feat_ref[0]                # (N_p, Fin_p)
    adj = adj_ref[0]                  # (N_p, N_p) == I + A (zero-padded rows/cols)
    N_p = adj.shape[0]
    L_p = wfp_ref.shape[-1]
    C_p = wcl_ref.shape[-1]

    # Embedding linear (f32 accumulation on the MXU).
    E = jnp.dot(feat, wemb_ref[...],
                preferred_element_type=jnp.float32) + bemb_ref[...]

    # Static Python bools -> no runtime cost; masks hoisted out of the loop.
    need_l_mask = l_valid < L_p
    if need_l_mask:
        l_mask = lax.broadcasted_iota(jnp.int32, (N_p, L_p), 1) < l_valid
    # {0,1} row selecting valid nodes; ones_row @ P does masking + the
    # over-node reduction in one MXU pass (instead of an XLU sublane reduce).
    ones_row = (lax.broadcasted_iota(jnp.int32, (1, N_p), 1)
                < n_valid).astype(jnp.float32)

    f = jnp.zeros((1, L_p), jnp.float32)

    # R is a small static constant -> Python unroll inside the traced kernel.
    for r in range(R):
        # v_node = embedding[node] + sum_{nbr} embedding[nbr]  ==  (I + A) @ E
        V = jnp.dot(adj, E.astype(cdtype), preferred_element_type=jnp.float32)

        # hidden[r] + ELU (alpha = 1). Elementwise math stays in f32 even when
        # matmul operands are bf16 (v5e VPU/EUP have no bf16 path).
        H = jnp.dot(V.astype(cdtype), wh_ref[r],
                    preferred_element_type=jnp.float32) + bh_ref[r]
        H = jnp.where(H > 0.0, H, jnp.exp(jnp.minimum(H, 0.0)) - 1.0)

        # output_fp[r] + per-node softmax over the (padded) L axis.
        logits = jnp.dot(H.astype(cdtype), wfp_ref[r],
                         preferred_element_type=jnp.float32) + bfp_ref[r]
        if need_l_mask:
            logits = jnp.where(l_mask, logits, -1e30)   # exclude padded lanes
        logits = logits - jnp.max(logits, axis=-1, keepdims=True)
        p = jnp.exp(logits)                              # EUP
        denom = jnp.sum(p, axis=-1, keepdims=True)
        p = p * pl.reciprocal(denom, approx=approx_recip)   # EUP slot

        # f accumulates softmax outputs of every *valid* node at every layer.
        f = f + jnp.dot(ones_row, p, preferred_element_type=jnp.float32)
        E = H

    # classifier + log_softmax over (valid) classes.
    cl = jnp.dot(f.astype(cdtype), wcl_ref[...],
                 preferred_element_type=jnp.float32) + bcl_ref[...]
    if c_valid < C_p:
        c_mask = lax.broadcasted_iota(jnp.int32, (1, C_p), 1) < c_valid
        cl = jnp.where(c_mask, cl, -1e30)
    cl = cl - jnp.max(cl, axis=-1, keepdims=True)
    lse = jnp.log(jnp.sum(jnp.exp(cl), axis=-1, keepdims=True))
    out_ref[0] = cl - lse


def neural_fingerprint(node_feat, adj_aug, params, *, R, num_class,
                       matmul_dtype=jnp.float32, approx_recip=False):
    """node_feat: (B, N, num_feat); adj_aug: (B, N, N) = A + I; params unpadded."""
    B, N, num_feat = node_feat.shape
    F_dim = params["W_emb"].shape[1]
    L_dim = params["W_cl"].shape[0]

    N_p = _round_up(N, SUBLANE)
    Fin_p = _round_up(num_feat, LANE)
    F_p = _round_up(F_dim, LANE)
    L_p = _round_up(L_dim, LANE)
    C_p = _round_up(num_class, LANE)

    md = matmul_dtype
    f32 = jnp.float32

    # Pad lane dims to 128 (weights / biases) and N to a sublane multiple.
    feat_p = _pad_to_shape(node_feat, (B, N_p, Fin_p)).astype(md)
    adj_p = _pad_to_shape(adj_aug, (B, N_p, N_p)).astype(md)
    W_emb = _pad_to_shape(params["W_emb"], (Fin_p, F_p)).astype(md)
    b_emb = _pad_to_shape(params["b_emb"], (1, F_p)).astype(f32)
    W_h = _pad_to_shape(params["W_h"], (R, F_p, F_p)).astype(md)
    b_h = _pad_to_shape(params["b_h"], (R, F_p)).reshape(R, 1, F_p).astype(f32)
    W_fp = _pad_to_shape(params["W_fp"], (R, F_p, L_p)).astype(md)
    b_fp = _pad_to_shape(params["b_fp"], (R, L_p)).reshape(R, 1, L_p).astype(f32)
    W_cl = _pad_to_shape(params["W_cl"], (L_p, C_p)).astype(md)
    b_cl = _pad_to_shape(params["b_cl"], (1, C_p)).astype(f32)

    inputs = (feat_p, adj_p, W_emb, b_emb, W_h, b_h, W_fp, b_fp, W_cl, b_cl)

    def resident_spec(x):
        nd = x.ndim
        return pl.BlockSpec(x.shape, lambda b, _nd=nd: (0,) * _nd)

    in_specs = [
        pl.BlockSpec((1, N_p, Fin_p), lambda b: (b, 0, 0)),   # per-graph stream
        pl.BlockSpec((1, N_p, N_p), lambda b: (b, 0, 0)),     # per-graph stream
    ] + [resident_spec(x) for x in inputs[2:]]                # resident weights

    out_specs = pl.BlockSpec((1, 1, C_p), lambda b: (b, 0, 0))

    # Advisory cost estimate (per graph, times batch).
    flops = B * (2 * N_p * Fin_p * F_p
                 + R * (2 * N_p * N_p * F_p
                        + 2 * N_p * F_p * F_p
                        + 2 * N_p * F_p * L_p
                        + 2 * N_p * L_p)          # ones_row @ P reduction
                 + 2 * L_p * C_p)
    transcendentals = B * (R * N_p * (F_p + L_p) + C_p)
    bytes_accessed = int(sum(x.size * x.dtype.itemsize for x in inputs)
                         + B * C_p * 4)

    kernel = functools.partial(
        neural_fingerprint_kernel,
        R=R, n_valid=N, l_valid=L_dim, c_valid=num_class,
        approx_recip=approx_recip)

    out = pl.pallas_call(
        kernel,
        out_shape=jax.ShapeDtypeStruct((B, 1, C_p), jnp.float32),
        grid=(B,),
        in_specs=in_specs,
        out_specs=out_specs,
        compiler_params=pltpu.CompilerParams(
            dimension_semantics=("parallel",)),
        cost_estimate=pl.CostEstimate(
            flops=int(flops),
            transcendentals=int(transcendentals),
            bytes_accessed=bytes_accessed),
    )(*inputs)

    return out[:, 0, :num_class]


def reference(node_feat, adj_aug, params, *, R):
    def one(feat, adj):
        E = feat @ params["W_emb"] + params["b_emb"]
        f = jnp.zeros((1, params["W_cl"].shape[0]), jnp.float32)
        for r in range(R):
            V = adj @ E
            H = jax.nn.elu(V @ params["W_h"][r] + params["b_h"][r:r + 1])
            P = jax.nn.softmax(H @ params["W_fp"][r] + params["b_fp"][r:r + 1],
                               axis=-1)
            f = f + jnp.sum(P, axis=0, keepdims=True)
            E = H
        return jax.nn.log_softmax(f @ params["W_cl"] + params["b_cl"],
                                  axis=-1)[0]
    return jax.vmap(one)(node_feat, adj_aug)


if __name__ == "__main__":
    # Small shapes consistent with the module: B graphs, N nodes, num_feat
    # input features, F hidden width, R radius, L fingerprint len, num_class.
    B, N, num_feat, F_dim, R, L_dim, num_class = 4, 8, 16, 32, 2, 16, 4

    key = jax.random.PRNGKey(0)
    ks = jax.random.split(key, 12)

    node_feat = jax.random.normal(ks[0], (B, N, num_feat), jnp.float32)

    # Random symmetric 0/1 adjacency per graph (no self-loops), then add the
    # identity so the neighbour sum includes the node itself.
    adj = (jax.random.uniform(ks[1], (B, N, N)) < 0.3).astype(jnp.float32)
    adj = jnp.maximum(adj, jnp.transpose(adj, (0, 2, 1)))
    adj = adj * (1.0 - jnp.eye(N, dtype=jnp.float32))
    adj_aug = adj + jnp.eye(N, dtype=jnp.float32)

    s = 0.1  # deterministic synthetic init (xavier-ish scale)
    params = {
        "W_emb": s * jax.random.normal(ks[2], (num_feat, F_dim), jnp.float32),
        "b_emb": s * jax.random.normal(ks[3], (1, F_dim), jnp.float32),
        "W_h":   s * jax.random.normal(ks[4], (R, F_dim, F_dim), jnp.float32),
        "b_h":   s * jax.random.normal(ks[5], (R, F_dim), jnp.float32),
        "W_fp":  s * jax.random.normal(ks[6], (R, F_dim, L_dim), jnp.float32),
        "b_fp":  s * jax.random.normal(ks[7], (R, L_dim), jnp.float32),
        "W_cl":  s * jax.random.normal(ks[8], (L_dim, num_class), jnp.float32),
        "b_cl":  s * jax.random.normal(ks[9], (1, num_class), jnp.float32),
    }

    ref = reference(node_feat, adj_aug, params, R=R)

    # Precise path: f32 MXU operands, exact reciprocal.
    out_f32 = neural_fingerprint(node_feat, adj_aug, params, R=R,
                                 num_class=num_class,
                                 matmul_dtype=jnp.float32,
                                 approx_recip=False)
    out_f32 = jax.block_until_ready(out_f32)
    assert out_f32.shape == (B, num_class)
    assert jnp.allclose(out_f32, ref, atol=1e-4, rtol=1e-4), (out_f32, ref)

    # Fast path (v6e/v7x): bf16 MXU operands, f32 accumulation/elementwise,
    # EUP approximate reciprocal for the softmax normalization.
    out_bf16 = neural_fingerprint(node_feat, adj_aug, params, R=R,
                                  num_class=num_class,
                                  matmul_dtype=jnp.bfloat16,
                                  approx_recip=True)
    out_bf16 = jax.block_until_ready(out_bf16)
    assert out_bf16.shape == (B, num_class)
    assert jnp.allclose(out_bf16, ref, atol=5e-2, rtol=5e-2), (out_bf16, ref)

    print("KERNEL_OK")
</pallas_src>

<mosaic_0001>
module attributes {stable_mosaic.version = 11 : i64} {
  func.func @neural_fingerprint_kernel(%arg0: i32, %arg1: memref<1x8x128xf32, #tpu.memory_space<vmem>>, %arg2: memref<1x8x8xf32, #tpu.memory_space<vmem>>, %arg3: memref<128x128xf32, #tpu.memory_space<vmem>>, %arg4: memref<1x128xf32, #tpu.memory_space<vmem>>, %arg5: memref<2x128x128xf32, #tpu.memory_space<vmem>>, %arg6: memref<2x1x128xf32, #tpu.memory_space<vmem>>, %arg7: memref<2x128x128xf32, #tpu.memory_space<vmem>>, %arg8: memref<2x1x128xf32, #tpu.memory_space<vmem>>, %arg9: memref<128x128xf32, #tpu.memory_space<vmem>>, %arg10: memref<1x128xf32, #tpu.memory_space<vmem>>, %arg11: memref<1x1x128xf32, #tpu.memory_space<vmem>>) attributes {dimension_semantics = [#tpu.dimension_semantics<parallel>], iteration_bounds = array<i64: 4>, scalar_prefetch = 0 : i64, scratch_operands = 0 : i64, tpu.core_type = #tpu.core_type<tc>, window_params = [{transform_indices = @transform_0, window_bounds = array<i64: 1, 8, 128>}, {transform_indices = @transform_1, window_bounds = array<i64: 1, 8, 8>}, {pipeline_mode = #tpu.pipeline_mode<synchronous>, transform_indices = @transform_2, window_bounds = array<i64: 128, 128>}, {pipeline_mode = #tpu.pipeline_mode<synchronous>, transform_indices = @transform_3, window_bounds = array<i64: 1, 128>}, {pipeline_mode = #tpu.pipeline_mode<synchronous>, transform_indices = @transform_4, window_bounds = array<i64: 2, 128, 128>}, {pipeline_mode = #tpu.pipeline_mode<synchronous>, transform_indices = @transform_5, window_bounds = array<i64: 2, 1, 128>}, {pipeline_mode = #tpu.pipeline_mode<synchronous>, transform_indices = @transform_6, window_bounds = array<i64: 2, 128, 128>}, {pipeline_mode = #tpu.pipeline_mode<synchronous>, transform_indices = @transform_7, window_bounds = array<i64: 2, 1, 128>}, {pipeline_mode = #tpu.pipeline_mode<synchronous>, transform_indices = @transform_8, window_bounds = array<i64: 128, 128>}, {pipeline_mode = #tpu.pipeline_mode<synchronous>, transform_indices = @transform_9, window_bounds = array<i64: 1, 128>}, {transform_indices = @transform_10, window_bounds = array<i64: 1, 1, 128>}]} {
    %c0 = arith.constant 0 : index
    %c0_0 = arith.constant 0 : index
    %c0_1 = arith.constant 0 : index
    %0 = vector.load %arg1[%c0, %c0_0, %c0_1] : memref<1x8x128xf32, #tpu.memory_space<vmem>>, vector<1x8x128xf32>
    %1 = vector.shape_cast %0 : vector<1x8x128xf32> to vector<8x128xf32>
    %c0_2 = arith.constant 0 : index
    %c0_3 = arith.constant 0 : index
    %c0_4 = arith.constant 0 : index
    %2 = vector.load %arg2[%c0_2, %c0_3, %c0_4] : memref<1x8x8xf32, #tpu.memory_space<vmem>>, vector<1x8x8xf32>
    %3 = vector.shape_cast %2 : vector<1x8x8xf32> to vector<8x8xf32>
    %c0_5 = arith.constant 0 : index
    %c0_6 = arith.constant 0 : index
    %4 = vector.load %arg3[%c0_5, %c0_6] : memref<128x128xf32, #tpu.memory_space<vmem>>, vector<128x128xf32>
    %cst = arith.constant dense<0.000000e+00> : vector<8x128xf32>
    %5 = tpu.matmul %1, %4, %cst {dimension_numbers = #tpu.dot_dimension_numbers<[1], [0], [0], [1], [0, 0, 1, 1], [], []>} : vector<8x128xf32>, vector<128x128xf32>, vector<8x128xf32> -> vector<8x128xf32>
    %c0_7 = arith.constant 0 : index
    %c0_8 = arith.constant 0 : index
    %6 = vector.load %arg4[%c0_7, %c0_8] : memref<1x128xf32, #tpu.memory_space<vmem>>, vector<1x128xf32>
    %7 = vector.broadcast %6 : vector<1x128xf32> to vector<8x128xf32>
    %8 = arith.addf %5, %7 : vector<8x128xf32>
    %9 = tpu.iota {dimensions = array<i32: 1>} : vector<8x128xi32>
    %c16_i32 = arith.constant 16 : i32
    %10 = vector.broadcast %c16_i32 : i32 to vector<8x128xi32>
    %11 = arith.cmpi slt, %9, %10 : vector<8x128xi32>
    %12 = tpu.iota {dimensions = array<i32: 1>} : vector<1x8xi32>
    %c8_i32 = arith.constant 8 : i32
    %13 = vector.broadcast %c8_i32 : i32 to vector<1x8xi32>
    %14 = arith.cmpi slt, %12, %13 : vector<1x8xi32>
    %15 = arith.extui %14 : vector<1x8xi1> to vector<1x8xi32>
    %16 = arith.sitofp %15 : vector<1x8xi32> to vector<1x8xf32>
    %cst_9 = arith.constant 0.000000e+00 : f32
    %17 = vector.broadcast %cst_9 : f32 to vector<1x128xf32>
    %cst_10 = arith.constant dense<0.000000e+00> : vector<8x128xf32>
    %18 = tpu.matmul %3, %8, %cst_10 {dimension_numbers = #tpu.dot_dimension_numbers<[1], [0], [0], [1], [0, 0, 1, 1], [], []>} : vector<8x8xf32>, vector<8x128xf32>, vector<8x128xf32> -> vector<8x128xf32>
    %c0_11 = arith.constant 0 : index
    %c0_12 = arith.constant 0 : index
    %c0_13 = arith.constant 0 : index
    %19 = vector.load %arg5[%c0_11, %c0_12, %c0_13] : memref<2x128x128xf32, #tpu.memory_space<vmem>>, vector<1x128x128xf32>
    %20 = vector.shape_cast %19 : vector<1x128x128xf32> to vector<128x128xf32>
    %cst_14 = arith.constant dense<0.000000e+00> : vector<8x128xf32>
    %21 = tpu.matmul %18, %20, %cst_14 {dimension_numbers = #tpu.dot_dimension_numbers<[1], [0], [0], [1], [0, 0, 1, 1], [], []>} : vector<8x128xf32>, vector<128x128xf32>, vector<8x128xf32> -> vector<8x128xf32>
    %c0_15 = arith.constant 0 : index
    %c0_16 = arith.constant 0 : index
    %c0_17 = arith.constant 0 : index
    %22 = vector.load %arg6[%c0_15, %c0_16, %c0_17] : memref<2x1x128xf32, #tpu.memory_space<vmem>>, vector<1x1x128xf32>
    %23 = vector.shape_cast %22 : vector<1x1x128xf32> to vector<1x128xf32>
    %24 = vector.broadcast %23 : vector<1x128xf32> to vector<8x128xf32>
    %25 = arith.addf %21, %24 : vector<8x128xf32>
    %cst_18 = arith.constant 0.000000e+00 : f32
    %26 = vector.broadcast %cst_18 : f32 to vector<8x128xf32>
    %27 = arith.cmpf ogt, %25, %26 : vector<8x128xf32>
    %cst_19 = arith.constant 0.000000e+00 : f32
    %28 = vector.broadcast %cst_19 : f32 to vector<8x128xf32>
    %29 = arith.minimumf %25, %28 : vector<8x128xf32>
    %30 = math.exp %29 : vector<8x128xf32>
    %cst_20 = arith.constant 1.000000e+00 : f32
    %31 = vector.broadcast %cst_20 : f32 to vector<8x128xf32>
    %32 = arith.subf %30, %31 : vector<8x128xf32>
    %33 = arith.select %27, %25, %32 : vector<8x128xi1>, vector<8x128xf32>
    %c0_21 = arith.constant 0 : index
    %c0_22 = arith.constant 0 : index
    %c0_23 = arith.constant 0 : index
    %34 = vector.load %arg7[%c0_21, %c0_22, %c0_23] : memref<2x128x128xf32, #tpu.memory_space<vmem>>, vector<1x128x128xf32>
    %35 = vector.shape_cast %34 : vector<1x128x128xf32> to vector<128x128xf32>
    %cst_24 = arith.constant dense<0.000000e+00> : vector<8x128xf32>
    %36 = tpu.matmul %33, %35, %cst_24 {dimension_numbers = #tpu.dot_dimension_numbers<[1], [0], [0], [1], [0, 0, 1, 1], [], []>} : vector<8x128xf32>, vector<128x128xf32>, vector<8x128xf32> -> vector<8x128xf32>
    %c0_25 = arith.constant 0 : index
    %c0_26 = arith.constant 0 : index
    %c0_27 = arith.constant 0 : index
    %37 = vector.load %arg8[%c0_25, %c0_26, %c0_27] : memref<2x1x128xf32, #tpu.memory_space<vmem>>, vector<1x1x128xf32>
    %38 = vector.shape_cast %37 : vector<1x1x128xf32> to vector<1x128xf32>
    %39 = vector.broadcast %38 : vector<1x128xf32> to vector<8x128xf32>
    %40 = arith.addf %36, %39 : vector<8x128xf32>
    %cst_28 = arith.constant -1.000000e+30 : f32
    %41 = vector.broadcast %cst_28 : f32 to vector<8x128xf32>
    %42 = arith.select %11, %40, %41 : vector<8x128xi1>, vector<8x128xf32>
    %cst_29 = arith.constant dense<0xFF800000> : vector<8xf32>
    %43 = vector.multi_reduction <maximumf>, %42, %cst_29 [1] : vector<8x128xf32> to vector<8xf32>
    %44 = vector.shape_cast %43 : vector<8xf32> to vector<8x1xf32>
    %45 = vector.broadcast %44 : vector<8x1xf32> to vector<8x128xf32>
    %46 = arith.subf %42, %45 : vector<8x128xf32>
    %47 = math.exp %46 : vector<8x128xf32>
    %cst_30 = arith.constant dense<0.000000e+00> : vector<8xf32>
    %48 = vector.multi_reduction <add>, %47, %cst_30 [1] : vector<8x128xf32> to vector<8xf32>
    %49 = vector.shape_cast %48 : vector<8xf32> to vector<8x1xf32>
    %50 = tpu.reciprocal %49 : vector<8x1xf32> -> vector<8x1xf32>
    %51 = vector.broadcast %50 : vector<8x1xf32> to vector<8x128xf32>
    %52 = arith.mulf %47, %51 : vector<8x128xf32>
    %cst_31 = arith.constant dense<0.000000e+00> : vector<1x128xf32>
    %53 = tpu.matmul %16, %52, %cst_31 {dimension_numbers = #tpu.dot_dimension_numbers<[1], [0], [0], [1], [0, 0, 1, 1], [], []>} : vector<1x8xf32>, vector<8x128xf32>, vector<1x128xf32> -> vector<1x128xf32>
    %54 = arith.addf %17, %53 : vector<1x128xf32>
    %cst_32 = arith.constant dense<0.000000e+00> : vector<8x128xf32>
    %55 = tpu.matmul %3, %33, %cst_32 {dimension_numbers = #tpu.dot_dimension_numbers<[1], [0], [0], [1], [0, 0, 1, 1], [], []>} : vector<8x8xf32>, vector<8x128xf32>, vector<8x128xf32> -> vector<8x128xf32>
    %c1 = arith.constant 1 : index
    %c0_33 = arith.constant 0 : index
    %c0_34 = arith.constant 0 : index
    %56 = vector.load %arg5[%c1, %c0_33, %c0_34] : memref<2x128x128xf32, #tpu.memory_space<vmem>>, vector<1x128x128xf32>
    %57 = vector.shape_cast %56 : vector<1x128x128xf32> to vector<128x128xf32>
    %cst_35 = arith.constant dense<0.000000e+00> : vector<8x128xf32>
    %58 = tpu.matmul %55, %57, %cst_35 {dimension_numbers = #tpu.dot_dimension_numbers<[1], [0], [0], [1], [0, 0, 1, 1], [], []>} : vector<8x128xf32>, vector<128x128xf32>, vector<8x128xf32> -> vector<8x128xf32>
    %c1_36 = arith.constant 1 : index
    %c0_37 = arith.constant 0 : index
    %c0_38 = arith.constant 0 : index
    %59 = vector.load %arg6[%c1_36, %c0_37, %c0_38] : memref<2x1x128xf32, #tpu.memory_space<vmem>>, vector<1x1x128xf32>
    %60 = vector.shape_cast %59 : vector<1x1x128xf32> to vector<1x128xf32>
    %61 = vector.broadcast %60 : vector<1x128xf32> to vector<8x128xf32>
    %62 = arith.addf %58, %61 : vector<8x128xf32>
    %cst_39 = arith.constant 0.000000e+00 : f32
    %63 = vector.broadcast %cst_39 : f32 to vector<8x128xf32>
    %64 = arith.cmpf ogt, %62, %63 : vector<8x128xf32>
    %cst_40 = arith.constant 0.000000e+00 : f32
    %65 = vector.broadcast %cst_40 : f32 to vector<8x128xf32>
    %66 = arith.minimumf %62, %65 : vector<8x128xf32>
    %67 = math.exp %66 : vector<8x128xf32>
    %cst_41 = arith.constant 1.000000e+00 : f32
    %68 = vector.broadcast %cst_41 : f32 to vector<8x128xf32>
    %69 = arith.subf %67, %68 : vector<8x128xf32>
    %70 = arith.select %64, %62, %69 : vector<8x128xi1>, vector<8x128xf32>
    %c1_42 = arith.constant 1 : index
    %c0_43 = arith.constant 0 : index
    %c0_44 = arith.constant 0 : index
    %71 = vector.load %arg7[%c1_42, %c0_43, %c0_44] : memref<2x128x128xf32, #tpu.memory_space<vmem>>, vector<1x128x128xf32>
    %72 = vector.shape_cast %71 : vector<1x128x128xf32> to vector<128x128xf32>
    %cst_45 = arith.constant dense<0.000000e+00> : vector<8x128xf32>
    %73 = tpu.matmul %70, %72, %cst_45 {dimension_numbers = #tpu.dot_dimension_numbers<[1], [0], [0], [1], [0, 0, 1, 1], [], []>} : vector<8x128xf32>, vector<128x128xf32>, vector<8x128xf32> -> vector<8x128xf32>
    %c1_46 = arith.constant 1 : index
    %c0_47 = arith.constant 0 : index
    %c0_48 = arith.constant 0 : index
    %74 = vector.load %arg8[%c1_46, %c0_47, %c0_48] : memref<2x1x128xf32, #tpu.memory_space<vmem>>, vector<1x1x128xf32>
    %75 = vector.shape_cast %74 : vector<1x1x128xf32> to vector<1x128xf32>
    %76 = vector.broadcast %75 : vector<1x128xf32> to vector<8x128xf32>
    %77 = arith.addf %73, %76 : vector<8x128xf32>
    %cst_49 = arith.constant -1.000000e+30 : f32
    %78 = vector.broadcast %cst_49 : f32 to vector<8x128xf32>
    %79 = arith.select %11, %77, %78 : vector<8x128xi1>, vector<8x128xf32>
    %cst_50 = arith.constant dense<0xFF800000> : vector<8xf32>
    %80 = vector.multi_reduction <maximumf>, %79, %cst_50 [1] : vector<8x128xf32> to vector<8xf32>
    %81 = vector.shape_cast %80 : vector<8xf32> to vector<8x1xf32>
    %82 = vector.broadcast %81 : vector<8x1xf32> to vector<8x128xf32>
    %83 = arith.subf %79, %82 : vector<8x128xf32>
    %84 = math.exp %83 : vector<8x128xf32>
    %cst_51 = arith.constant dense<0.000000e+00> : vector<8xf32>
    %85 = vector.multi_reduction <add>, %84, %cst_51 [1] : vector<8x128xf32> to vector<8xf32>
    %86 = vector.shape_cast %85 : vector<8xf32> to vector<8x1xf32>
    %87 = tpu.reciprocal %86 : vector<8x1xf32> -> vector<8x1xf32>
    %88 = vector.broadcast %87 : vector<8x1xf32> to vector<8x128xf32>
    %89 = arith.mulf %84, %88 : vector<8x128xf32>
    %cst_52 = arith.constant dense<0.000000e+00> : vector<1x128xf32>
    %90 = tpu.matmul %16, %89, %cst_52 {dimension_numbers = #tpu.dot_dimension_numbers<[1], [0], [0], [1], [0, 0, 1, 1], [], []>} : vector<1x8xf32>, vector<8x128xf32>, vector<1x128xf32> -> vector<1x128xf32>
    %91 = arith.addf %54, %90 : vector<1x128xf32>
    %c0_53 = arith.constant 0 : index
    %c0_54 = arith.constant 0 : index
    %92 = vector.load %arg9[%c0_53, %c0_54] : memref<128x128xf32, #tpu.memory_space<vmem>>, vector<128x128xf32>
    %cst_55 = arith.constant dense<0.000000e+00> : vector<1x128xf32>
    %93 = tpu.matmul %91, %92, %cst_55 {dimension_numbers = #tpu.dot_dimension_numbers<[1], [0], [0], [1], [0, 0, 1, 1], [], []>} : vector<1x128xf32>, vector<128x128xf32>, vector<1x128xf32> -> vector<1x128xf32>
    %c0_56 = arith.constant 0 : index
    %c0_57 = arith.constant 0 : index
    %94 = vector.load %arg10[%c0_56, %c0_57] : memref<1x128xf32, #tpu.memory_space<vmem>>, vector<1x128xf32>
    %95 = arith.addf %93, %94 : vector<1x128xf32>
    %96 = tpu.iota {dimensions = array<i32: 1>} : vector<1x128xi32>
    %c4_i32 = arith.constant 4 : i32
    %97 = vector.broadcast %c4_i32 : i32 to vector<1x128xi32>
    %98 = arith.cmpi slt, %96, %97 : vector<1x128xi32>
    %cst_58 = arith.constant -1.000000e+30 : f32
    %99 = vector.broadcast %cst_58 : f32 to vector<1x128xf32>
    %100 = arith.select %98, %95, %99 : vector<1x128xi1>, vector<1x128xf32>
    %cst_59 = arith.constant dense<0xFF800000> : vector<1xf32>
    %101 = vector.multi_reduction <maximumf>, %100, %cst_59 [1] : vector<1x128xf32> to vector<1xf32>
    %102 = vector.shape_cast %101 : vector<1xf32> to vector<1x1xf32>
    %103 = vector.broadcast %102 : vector<1x1xf32> to vector<1x128xf32>
    %104 = arith.subf %100, %103 : vector<1x128xf32>
    %105 = math.exp %104 : vector<1x128xf32>
    %cst_60 = arith.constant dense<0.000000e+00> : vector<1xf32>
    %106 = vector.multi_reduction <add>, %105, %cst_60 [1] : vector<1x128xf32> to vector<1xf32>
    %107 = vector.shape_cast %106 : vector<1xf32> to vector<1x1xf32>
    %108 = math.log %107 : vector<1x1xf32>
    %109 = vector.broadcast %108 : vector<1x1xf32> to vector<1x128xf32>
    %110 = arith.subf %104, %109 : vector<1x128xf32>
    %c0_61 = arith.constant 0 : index
    %c0_62 = arith.constant 0 : index
    %c0_63 = arith.constant 0 : index
    %111 = vector.load %arg11[%c0_61, %c0_62, %c0_63] : memref<1x1x128xf32, #tpu.memory_space<vmem>>, vector<1x1x128xf32>
    %112 = vector.shape_cast %111 : vector<1x1x128xf32> to vector<1x128xf32>
    %113 = vector.shape_cast %110 : vector<1x128xf32> to vector<1x1x128xf32>
    tpu.vector_store %arg11[%c0_61, %c0_62, %c0_63], %113 {strides = array<i32>} : memref<1x1x128xf32, #tpu.memory_space<vmem>>, vector<1x1x128xf32>,
    return
  }
  func.func @transform_0(%arg0: i32) -> (i32, i32, i32) {
    %c0_i32 = arith.constant 0 : i32
    %c0_i32_0 = arith.constant 0 : i32
    %c0_i32_1 = arith.constant 0 : i32
    return %arg0, %c0_i32, %c0_i32_0 : i32, i32, i32
  }
  func.func @transform_1(%arg0: i32) -> (i32, i32, i32) {
    %c0_i32 = arith.constant 0 : i32
    %c0_i32_0 = arith.constant 0 : i32
    %c0_i32_1 = arith.constant 0 : i32
    return %arg0, %c0_i32, %c0_i32_0 : i32, i32, i32
  }
  func.func @transform_2(%arg0: i32) -> (i32, i32) {
    %c0_i32 = arith.constant 0 : i32
    %c0_i32_0 = arith.constant 0 : i32
    %c0_i32_1 = arith.constant 0 : i32
    return %c0_i32, %c0_i32_0 : i32, i32
  }
  func.func @transform_3(%arg0: i32) -> (i32, i32) {
    %c0_i32 = arith.constant 0 : i32
    %c0_i32_0 = arith.constant 0 : i32
    %c0_i32_1 = arith.constant 0 : i32
    return %c0_i32, %c0_i32_0 : i32, i32
  }
  func.func @transform_4(%arg0: i32) -> (i32, i32, i32) {
    %c0_i32 = arith.constant 0 : i32
    %c0_i32_0 = arith.constant 0 : i32
    %c0_i32_1 = arith.constant 0 : i32
    %c0_i32_2 = arith.constant 0 : i32
    return %c0_i32, %c0_i32_0, %c0_i32_1 : i32, i32, i32
  }
  func.func @transform_5(%arg0: i32) -> (i32, i32, i32) {
    %c0_i32 = arith.constant 0 : i32
    %c0_i32_0 = arith.constant 0 : i32
    %c0_i32_1 = arith.constant 0 : i32
    %c0_i32_2 = arith.constant 0 : i32
    return %c0_i32, %c0_i32_0, %c0_i32_1 : i32, i32, i32
  }
  func.func @transform_6(%arg0: i32) -> (i32, i32, i32) {
    %c0_i32 = arith.constant 0 : i32
    %c0_i32_0 = arith.constant 0 : i32
    %c0_i32_1 = arith.constant 0 : i32
    %c0_i32_2 = arith.constant 0 : i32
    return %c0_i32, %c0_i32_0, %c0_i32_1 : i32, i32, i32
  }
  func.func @transform_7(%arg0: i32) -> (i32, i32, i32) {
    %c0_i32 = arith.constant 0 : i32
    %c0_i32_0 = arith.constant 0 : i32
    %c0_i32_1 = arith.constant 0 : i32
    %c0_i32_2 = arith.constant 0 : i32
    return %c0_i32, %c0_i32_0, %c0_i32_1 : i32, i32, i32
  }
  func.func @transform_8(%arg0: i32) -> (i32, i32) {
    %c0_i32 = arith.constant 0 : i32
    %c0_i32_0 = arith.constant 0 : i32
    %c0_i32_1 = arith.constant 0 : i32
    return %c0_i32, %c0_i32_0 : i32, i32
  }
  func.func @transform_9(%arg0: i32) -> (i32, i32) {
    %c0_i32 = arith.constant 0 : i32
    %c0_i32_0 = arith.constant 0 : i32
    %c0_i32_1 = arith.constant 0 : i32
    return %c0_i32, %c0_i32_0 : i32, i32
  }
  func.func @transform_10(%arg0: i32) -> (i32, i32, i32) {
    %c0_i32 = arith.constant 0 : i32
    %c0_i32_0 = arith.constant 0 : i32
    %c0_i32_1 = arith.constant 0 : i32
    return %arg0, %c0_i32, %c0_i32_0 : i32, i32, i32
  }
}

</mosaic_0001>

<bundles_post_ra>
// kernel: tpu_custom_call.1
= control target key start
LH: loop header
LB: loop body
LE: loop exit
PB: predicated region body
PF: predicated region fallthrough
CT: control target
= control target key end

     0   :  { %s2906_s0 = inlined_call_operand.hbm [shape: f32[4,8,128], index: 0, kind: input, shape index: {}]   ;;  %s2907_s1 = inlined_call_operand.hbm [shape: f32[4,8,8], index: 1, kind: input, shape index: {}]   ;;  %s2908_s2 = inlined_call_operand.hbm [shape: f32[128,128], index: 2, kind: input, shape index: {}]   ;;  %s2909_s3 = inlined_call_operand.vmem [shape: f32[1,128], index: 3, kind: input, shape index: {}]   ;;  %s2910_s4 = inlined_call_operand.hbm [shape: f32[2,128,128], index: 4, kind: input, shape index: {}]   ;;  %s2911_s5 = inlined_call_operand.vmem [shape: f32[2,1,128], index: 5, kind: input, shape index: {}]   ;;  %s2912_s6 = inlined_call_operand.hbm [shape: f32[2,128,128], index: 6, kind: input, shape index: {}]   ;;  %s2913_s7 = inlined_call_operand.vmem [shape: f32[2,1,128], index: 7, kind: input, shape index: {}]   ;;  %s2914_s8 = inlined_call_operand.hbm [shape: f32[128,128], index: 8, kind: input, shape index: {}]   ;;  %s2915_s9 = inlined_call_operand.vmem [shape: f32[1,128], index: 9, kind: input, shape index: {}]   ;;  %s2916_s10 = inlined_call_operand.hbm [shape: f32[4,1,128], index: 10, kind: output, shape index: {}]  }
   0x1   :  { %2922 = sst [smem:[#allocation21_spill]] %s2908_s2 }
   0x2   :  { %2923 = sst [smem:[#allocation22_spill]] %s2910_s4 }
   0x3   :  { %2924 = sst [smem:[#allocation23_spill]] %s2912_s6 }
   0x4   :  { %2925 = sst [smem:[#allocation24_spill]] %s2914_s8 }
   0x5   :  { %2926 = sst [smem:[#allocation25_spill]] %s2915_s9 }
   0x6   :  { %2927 = sst [smem:[#allocation26_spill]] %s2916_s10 }
   0x7   :  { %15 = vsyncpa [#allocation3], 0 }
   0x8   :  { %17 = vsyncpa [#allocation3 + $0x1], 0 }
   0x9   :  { %18 = vsyncpa [#allocation6], 0 }
   0xa   :  { %20 = vsyncpa [#allocation6 + $0x1], 0 }
   0xb   :  { %21 = vsyncpa [#allocation9], 0 }
   0xc   :  { %22 = vsyncpa [#allocation12], 0 }
   0xd   :  { %23 = vsyncpa [#allocation4], 0 }
   0xe   :  { %25 = vsyncpa [#allocation4 + $0x1], 0  ;;  %s2465_s13 = smov 0   ;;  %s2467_s14 = smov 0  }
   0xf   :  { %s2469_s15 = smov 0   ;;  %s2471_s16 = smov 0  }
  0x10 LB: > { %s2398_s17 = smov [#allocation7]   ;;  %s2486_s19 = sadd.s32 4294967295, %s2396_s16   ;;  %s2396_s16 = sphi %s2471_s16, %s2958_s16   ;;  %s2392_s15 = sphi %s2469_s15, %s2957_s15   ;;  %s2388_s14 = sphi %s2467_s14, %s2956_s14   ;;  %s2384_s13 = sphi %s2465_s13, %s2955_s13  }
  0x11   : > { %s294_s18 = sshll.u32 %s2398_s17, 4  ;;  %p1509_p0 = scmp.ge.s32.totalorder %s2396_s16, 1  ;;  %s2491_s18 = int_to_ptr.vmem [resolvable:$true] %s294_s18 }
  0x12   : > { %p2918_p1 = scmp.eq.s32.totalorder %s2486_s19, 0  ;;  %p282_p2 = scmp.lt.s32.totalorder %s2396_s16, 5 }
  0x13   : > { %s2399_s21 = smov [#allocation8]   ;;  %s2400_s24 = smov [#allocation10]  }
  0x14   : > { %p2493_p3 = pnand %p1509_p0, %p282_p2  ;;  %s310_s22 = sshll.u32 %s2399_s21, 4  ;;  %s2505_s22 = int_to_ptr.vmem [resolvable:$true] %s310_s22 }
  0x15   : > { %s326_s25 = sshll.u32 %s2400_s24, 4  ;;  %s2930_s2 = sld [smem:[#allocation21_spill]]  ;;  %s2507_s25 = int_to_ptr.vmem [resolvable:$true] %s326_s25 }
  0x16   : > { %s2928_s20 = scalar_select %p2493_p3, 1, 0 }
  0x17   : > { %p2051_p4 = pneg %p2493_p3 }
  0x19   : > { %p2501_p5 = pnand %p2051_p4, %p2918_p1 }
  0x1b   : > { %s2142_s28 = scalar_lea.hbm %s2930_s2, 2048  ;;  %p2517_p7 = pneg %p2501_p5 }
  0x1c   : > { %p2143_p6 = scmp.ne.s32.totalorder %s2930_s2, %s2142_s28  ;;  %p2149_p10 = scmp.lt.u32.totalorder %s2142_s28, %s2930_s2 }
  0x1e   : > { %p2145_p8 = pnand %p2517_p7, %p2143_p6 }
  0x20   : > { %p2146_p9 = pneg %p2145_p8 }
  0x22   : > { %p2151_p11 = pnand %p2149_p10, %p2146_p9 }
  0x24   : > { %2154 = shalt.err (!%p2151_p11)
}
  0x25   : > { %s2155_s21 = scalar_lea.vmem %s2491_s18, 2048  ;;  %p2163_p2 = scmp.lt.s32.totalorder %s2491_s18, %s2491_s18 }
  0x26   : > { %p2156_p12 = scmp.ne.s32.totalorder %s2491_s18, %s2155_s21  ;;  %p2164_p4 = scmp.lt.s32.totalorder %s2155_s21, %s2155_s21 }
  0x28   : > { %p2158_p13 = pnand %p2156_p12, %p2517_p7  ;;  %p2165_p6 = por %p2164_p4, %p2163_p2 }
  0x2a   : > { %p2159_p0 = pneg %p2158_p13 }
  0x2c   : > { %p2166_p8 = pnand %p2165_p6, %p2159_p0 }
  0x2e   : > { %2169 = shalt.err (!%p2166_p8)
}
  0x2f   : > { %s2401_s24 = smov 128   ;;  %s2402_s26 = smov 8  }
  0x30   : > { %2054 = dma.hbm_to_vmem [thread:$0]  (!%p2501_p5), %s2930_s2, 2048, %s2491_s18, [#allocation6], %s2401_s24, %s2401_s24, %s2402_s26  }
  0x31   : > { %s2932_s4 = sld [smem:[#allocation22_spill]] }
  0x37   : > { %s2170_s12 = scalar_lea.hbm %s2932_s4, 4096 }
  0x38   : > { %p2171_p9 = scmp.ne.s32.totalorder %s2932_s4, %s2170_s12  ;;  %p2177_p12 = scmp.lt.u32.totalorder %s2170_s12, %s2932_s4 }
  0x3a   : > { %p2173_p10 = pnand %p2171_p9, %p2517_p7 }
  0x3c   : > { %p2174_p11 = pneg %p2173_p10 }
  0x3e   : > { %p2179_p13 = pnand %p2177_p12, %p2174_p11 }
  0x40   : > { %2182 = shalt.err (!%p2179_p13)
}
  0x41   : > { %s2183_s18 = scalar_lea.vmem %s2505_s22, 4096  ;;  %p2191_p6 = scmp.lt.s32.totalorder %s2505_s22, %s2505_s22 }
  0x42   : > { %p2184_p0 = scmp.ne.s32.totalorder %s2505_s22, %s2183_s18  ;;  %p2192_p8 = scmp.lt.s32.totalorder %s2183_s18, %s2183_s18 }
  0x44   : > { %p2186_p2 = pnand %p2184_p0, %p2517_p7  ;;  %p2193_p9 = por %p2192_p8, %p2191_p6 }
  0x46   : > { %p2187_p4 = pneg %p2186_p2 }
  0x48   : > { %p2194_p10 = pnand %p2193_p9, %p2187_p4 }
  0x4a   : > { %2197 = shalt.err (!%p2194_p10)
}
  0x4b   : > { %2057 = dma.hbm_to_vmem [thread:$0]  (!%p2501_p5), %s2932_s4, 4096, %s2505_s22, [#allocation9], %s2401_s24, %s2401_s24, %s2402_s26  }
  0x4c   : > { %s2933_s6 = sld [smem:[#allocation23_spill]] }
  0x52   : > { %s2198_s29 = scalar_lea.hbm %s2933_s6, 4096 }
  0x53   : > { %p2199_p11 = scmp.ne.s32.totalorder %s2933_s6, %s2198_s29  ;;  %p2205_p0 = scmp.lt.u32.totalorder %s2198_s29, %s2933_s6 }
  0x55   : > { %p2201_p12 = pnand %p2199_p11, %p2517_p7 }
  0x57   : > { %p2202_p13 = pneg %p2201_p12 }
  0x59   : > { %p2207_p2 = pnand %p2205_p0, %p2202_p13 }
  0x5b   : > { %2210 = shalt.err (!%p2207_p2)
}
  0x5c   : > { %s2211_s22 = scalar_lea.vmem %s2507_s25, 4096  ;;  %p2219_p9 = scmp.lt.s32.totalorder %s2507_s25, %s2507_s25 }
  0x5d   : > { %p2212_p4 = scmp.ne.s32.totalorder %s2507_s25, %s2211_s22  ;;  %p2220_p10 = scmp.lt.s32.totalorder %s2211_s22, %s2211_s22 }
  0x5f   : > { %p2214_p6 = pnand %p2212_p4, %p2517_p7  ;;  %p2221_p11 = por %p2220_p10, %p2219_p9 }
  0x61   : > { %p2215_p8 = pneg %p2214_p6 }
  0x63   : > { %p2222_p12 = pnand %p2221_p11, %p2215_p8 }
  0x65   : > { %2225 = shalt.err (!%p2222_p12)
}
  0x66   : > { %2060 = dma.hbm_to_vmem [thread:$0]  (!%p2501_p5), %s2933_s6, 4096, %s2507_s25, [#allocation9], %s2401_s24, %s2401_s24, %s2402_s26  }
  0x67   : > { %s2403_s10 = smov [#allocation11]   ;;  %s2934_s8 = sld [smem:[#allocation24_spill]] }
  0x68   : > { %s342_s27 = sshll.u32 %s2403_s10, 4  ;;  %s343_s27 = int_to_ptr.vmem [resolvable:$true] %s342_s27 }
  0x6d   : > { %s2226_s30 = scalar_lea.hbm %s2934_s8, 2048 }
  0x6e   : > { %p2227_p13 = scmp.ne.s32.totalorder %s2934_s8, %s2226_s30  ;;  %p2233_p4 = scmp.lt.u32.totalorder %s2226_s30, %s2934_s8 }
  0x70   : > { %p2229_p0 = pnand %p2227_p13, %p2517_p7 }
  0x72   : > { %p2230_p2 = pneg %p2229_p0 }
  0x74   : > { %p2235_p6 = pnand %p2233_p4, %p2230_p2 }
  0x76   : > { %2238 = shalt.err (!%p2235_p6)
}
  0x77   : > { %s2239_s25 = scalar_lea.vmem %s343_s27, 2048  ;;  %p2247_p11 = scmp.lt.s32.totalorder %s343_s27, %s343_s27 }
  0x78   : > { %p2240_p8 = scmp.ne.s32.totalorder %s343_s27, %s2239_s25  ;;  %p2248_p12 = scmp.lt.s32.totalorder %s2239_s25, %s2239_s25 }
  0x7a   : > { %p2242_p9 = pnand %p2240_p8, %p2517_p7  ;;  %p2249_p1 = por %p2248_p12, %p2247_p11 }
  0x7c   : > { %p2243_p10 = pneg %p2242_p9 }
  0x7e   : > { %p2250_p3 = pnand %p2249_p1, %p2243_p10 }
  0x80   : > { %2253 = shalt.err (!%p2250_p3)
}
  0x81   : > { %2063 = dma.hbm_to_vmem [thread:$0]  (!%p2501_p5), %s2934_s8, 2048, %s343_s27, [#allocation12], %s2401_s24, %s2401_s24, %s2402_s26  }
  0x82   : > { %s1508_s23 = sadd.s32 4294967294, %s2396_s16   ;;  %s2616_s11 = sadd.s32 1, %s2396_s16  }
  0x83   : > { %s35_s10 = ssub.s32 %s2396_s16, %s2616_s11  ;;  %s38_s28 = sadd.s32 1, %s2392_s15 }
  0x84   : > { %p36_p1 = scmp.eq.s32.totalorder %s35_s10, 0  ;;  %p45_p3 = scmp.ne.s32.totalorder %s2392_s15, %s2388_s14 }
  0x85   : > { %p46_p7 = scmp.eq.s32.totalorder %s2396_s16, 0  ;;  %p51_p13 = scmp.ne.s32.totalorder %s2388_s14, %s2384_s13 }
  0x86   : > { %s2627_s29 = scalar_select %p36_p1, %s2392_s15, %s38_s28  }
  0x87   : > { %p2629_p0 = por %p46_p7, %p45_p3  ;;  %p2937_p2 = scmp.eq.s32.totalorder %s2486_s19, 0 }
  0x88   : > { %2935 = sst [smem:[#allocation20_spill]] %s2627_s29  ;;  %p269_p4 = scmp.eq.s32.totalorder %s2486_s19, 3 }
  0x89   : > { %p2635_p5 = por %p2937_p2, %p51_p13  ;;  %p275_p6 = scmp.eq.s32.totalorder %s1508_s23, 3 }
  0x8a   : > { %p2079_p8 = scmp.lt.s32.totalorder %s2396_s16, 4  ;;  %s359_s26 = sand.u32 1, %s2392_s15  }
  0x8b   : > { %s2938_s24 = scalar_select %p2635_p5, 1, 0 }
  0x8c   : > { %p2642_p9 = por %p269_p4, %p45_p3  ;;  %p2646_p10 = por %p275_p6, %p51_p13 }
  0x8d   : > { %s2650_s17 = sshll.u32 %s359_s26, 3  ;;  %s1516_s21 = sshll.u32 %s2396_s16, 7 }
  0x8e   : > { %s2939_s27 = scalar_select %p2642_p9, 1, 0 }
  0x8f   : > { %s2940_s12 = scalar_select %p2646_p10, 1, 0 }
  0x90   : > { %s2656_s18 = scalar_lea.hbm %s2906_s0, %s1516_s21  ;;  %s363_s9 = scalar_lea.vmem [#allocation2], %s2650_s17 }
  0x91   : > { %s370_s23 = sshll.u32 %s363_s9, 4  ;;  %p2663_p11 = pnand %p2079_p8, %p2629_p0  ;;  %s2659_s23 = int_to_ptr.vmem [resolvable:$true] %s370_s23 }
  0x92   : > { %s2670_s22 = scalar_lea.hbm %s2907_s1, %s1516_s21  ;;  %s377_s25 = sand.u32 1, %s2396_s16  }
  0x93   : > { %s360_s4 = scalar_lea.sflag [#allocation3], %s359_s26  ;;  %s2254_s6 = scalar_lea.hbm %s2656_s18, 128 }
  0x94   : > { %p2255_p12 = scmp.ne.s32.totalorder %s2656_s18, %s2254_s6  ;;  %p2256_p1 = pneg %p2663_p11 }
  0x95   : > { %s2259_s8 = scalar_lea.hbm %s2906_s0, 512  ;;  %p2260_p13 = scmp.lt.u32.totalorder %s2656_s18, %s2906_s0 }
  0x96   : > { %p2257_p3 = pnand %p2256_p1, %p2255_p12  ;;  %p2261_p0 = scmp.lt.u32.totalorder %s2259_s8, %s2254_s6 }
  0x97   : > { %p2263_p4 = scmp.lt.u32.totalorder %s2254_s6, %s2656_s18 }
  0x98   : > { %p2258_p7 = pneg %p2257_p3  ;;  %p2262_p2 = por %p2261_p0, %p2260_p13 }
  0x9a   : > { %p2264_p6 = por %p2263_p4, %p2262_p2 }
  0x9c   : > { %p2265_p8 = pnand %p2264_p6, %p2258_p7 }
  0x9e   : > { %2268 = shalt.err (!%p2265_p8)
}
  0x9f   : > { %s2269_s26 = scalar_lea.vmem %s2659_s23, 128  ;;  %s2404_s21 = smov [#allocation2]  }
  0xa0   : > { %p2270_p12 = scmp.ne.s32.totalorder %s2659_s23, %s2269_s26  ;;  %s2274_s28 = sshll.u32 %s2404_s21, 4  ;;  %s2275_s28 = int_to_ptr.vmem [resolvable:$false] %s2274_s28 }
  0xa1   : > { %s2276_s29 = scalar_lea.vmem %s2275_s28, 256  ;;  %p2277_p9 = scmp.lt.s32.totalorder %s2659_s23, %s2275_s28 }
  0xa2   : > { %p2272_p3 = pnand %p2270_p12, %p2256_p1  ;;  %p2278_p13 = scmp.lt.s32.totalorder %s2276_s29, %s2269_s26 }
  0xa4   : > { %p2273_p10 = pneg %p2272_p3  ;;  %p2279_p0 = por %p2278_p13, %p2277_p9 }
  0xa6   : > { %p2280_p2 = pnand %p2279_p0, %p2273_p10 }
  0xa8   : > { %2283 = shalt.err (!%p2280_p2)
}
  0xa9   : > { %2067 = dma.hbm_to_vmem [thread:$0]  (!%p2663_p11), %s2656_s18, 128, %s2659_s23, %s360_s4  }
  0xaa   : > { %s381_s6 = scalar_lea.vmem [#allocation5], %s2650_s17  ;;  %s378_s30 = scalar_lea.sflag [#allocation6], %s377_s25 }
  0xab   : > { %s388_s8 = sshll.u32 %s381_s6, 4  ;;  %s2284_s9 = scalar_lea.hbm %s2670_s22, 128  ;;  %s389_s8 = int_to_ptr.vmem [resolvable:$true] %s388_s8 }
  0xac   : > { %p2285_p9 = scmp.ne.s32.totalorder %s2670_s22, %s2284_s9  ;;  %s2289_s21 = scalar_lea.hbm %s2907_s1, 512 }
  0xad   : > { %p2290_p4 = scmp.lt.u32.totalorder %s2670_s22, %s2907_s1  ;;  %p2291_p6 = scmp.lt.u32.totalorder %s2289_s21, %s2284_s9 }
  0xae   : > { %p2287_p10 = pnand %p2285_p9, %p2256_p1  ;;  %p2293_p12 = scmp.lt.u32.totalorder %s2284_s9, %s2670_s22 }
  0xaf   : > { %p2292_p8 = por %p2291_p6, %p2290_p4 }
  0xb0   : > { %p2288_p7 = pneg %p2287_p10 }
  0xb1   : > { %p2294_p3 = por %p2293_p12, %p2292_p8 }
  0xb3   : > { %p2295_p13 = pnand %p2294_p3, %p2288_p7 }
  0xb5   : > { %2298 = shalt.err (!%p2295_p13)
}
  0xb6   : > { %s2299_s4 = scalar_lea.vmem %s389_s8, 128  ;;  %s2405_s17 = smov [#allocation5]  }
  0xb7   : > { %p2300_p0 = scmp.ne.s32.totalorder %s389_s8, %s2299_s4  ;;  %s2304_s18 = sshll.u32 %s2405_s17, 4  ;;  %s2305_s18 = int_to_ptr.vmem [resolvable:$false] %s2304_s18 }
  0xb8   : > { %s2306_s23 = scalar_lea.vmem %s2305_s18, 256  ;;  %p2307_p10 = scmp.lt.s32.totalorder %s389_s8, %s2305_s18 }
  0xb9   : > { %p2302_p2 = pnand %p2300_p0, %p2256_p1  ;;  %p2308_p5 = scmp.lt.s32.totalorder %s2306_s23, %s2299_s4 }
  0xbb   : > { %p2303_p9 = pneg %p2302_p2  ;;  %p2309_p4 = por %p2308_p5, %p2307_p10 }
  0xbd   : > { %p2310_p6 = pnand %p2309_p4, %p2303_p9 }
  0xbf   : > { %2313 = shalt.err (!%p2310_p6)
}
  0xc0   : > { %2070 = dma.hbm_to_vmem [thread:$0]  (!%p2663_p11), %s2670_s22, 128, %s389_s8, %s378_s30  }
  0xc1   : > { %p2942_p7 = scmp.ne.s32.totalorder %s2928_s20, 0 }
  0xc2   : > { %s2723_s25 = sand.u32 (!%p2942_p7), 1, %s2388_s14   ;;  %p2943_p5 = scmp.ne.s32.totalorder (!%p2942_p7), %s2938_s24, 0 }
  0xc3   : > { %397 = sbr.rel (%p2942_p7) target bundleno = 2651 (0xa5b), region = 60  ;;  %s1520_s6 = sshll.u32 (!%p2942_p7), %s2723_s25, 3 }
  0xc4   : > { %s400_s9 = scalar_lea.sflag (!%p2942_p7), [#allocation3], %s2723_s25  ;;  %s2727_s2 = scalar_lea.vmem (!%p2942_p7), [#allocation2], %s1520_s6 }
  0xca   : > { %2359 = dma.done.wait (%p2943_p5), %s400_s9, 128  }
  0xcb   : > { %2361 = vsyncadd (%p2943_p5), %s400_s9, 4294967168  ;;  %s408_s10 = sand.u32 1, %s2486_s19   ;;  %s2734_s22 = scalar_lea.vmem [#allocation5], %s1520_s6 }
  0xcc   : > { %s409_s20 = scalar_lea.sflag [#allocation6], %s408_s10 }
  0xcd   : > { %2363 = dma.done.wait (%p2943_p5), %s409_s20, 128  }
  0xce   : > { %2365 = vsyncadd (%p2943_p5), %s409_s20, 4294967168  ;;  %p2944_p11 = scmp.eq.s32.totalorder %s2486_s19, 0 }
  0xd0   : > { %2367 = dma.done.wait (%p2944_p11), [#allocation6], 2048   ;;  %p2945_p1 = pmov %p2944_p11 }
  0xd2   : > { %2369 = vsyncadd (%p2945_p1), [#allocation6], 4294965248  ;;  %p2946_p8 = pmov %p2945_p1 }
  0xd3   : > { %p2947_p12 = pmov %p2945_p1 }
  0xd4   : > { %2371 = dma.done.wait (%p2946_p8), [#allocation9], 8192  }
  0xd5   : > { %2373 = vsyncadd (%p2947_p12), [#allocation9], 4294959104  ;;  %p2948_p3 = pmov %p2945_p1 }
  0xd6   : > { %p2949_p13 = pmov %p2945_p1 }
  0xd7   : > { %2375 = dma.done.wait (%p2948_p3), [#allocation12], 2048  }
  0xd8   : > { %2377 = vsyncadd (%p2949_p13), [#allocation12], 4294965248  ;;  %v2406_v0 = vmov 0.0|0.0   ;;  %vm2407_vm0 = vmmov 0   ;;  %v2408_v1 = vmov 0.0   ;;  %v471_v2 = vld [vmem:[#allocation7] sm:$0xff] }
  0xd9   : > { %1883 = vmatprep.subr.bf16.mxu0 %v2406_v0  ;;  %1685 = vmatprep.mubr.msk.f32.mxu0 %vm2407_vm0, %v2408_v1  ;;  %v472_v3 = vld [vmem:[#allocation7 + $0x8] sm:$0xff]  ;;  %v473_v4 = vld [vmem:[#allocation7 + $0x10] sm:$0xff]  ;;  %v474_v6 = vld [vmem:[#allocation7 + $0x18] sm:$0xff]  ;;  %vm570_vm1 = vcmask 64512   ;;  %s2950_s9 = sld [smem:[#allocation25_spill]]  ;;  %vm1354_vm7 = vcmask 1040384  }
  0xda   : > { %1907 = vmatprep.subr.bf16.mxu1 %v2406_v0  ;;  %1725 = vmatprep.mubr.msk.f32.mxu1 %vm2407_vm0, %v2408_v1  ;;  %v1884_v5 = vpack.c.bf16 %v472_v3, %v471_v2  ;;  %v1887_v7 = vpack.c.bf16 %v474_v6, %v473_v4  ;;  %v475_v8 = vld [vmem:[#allocation7 + $0x20] sm:$0xff]  ;;  %v476_v9 = vld [vmem:[#allocation7 + $0x28] sm:$0xff]  ;;  %v477_v11 = vld [vmem:[#allocation7 + $0x30] sm:$0xff]  ;;  %s468_s10 = scalar_lea.vmem [#allocation13], %s2723_s25  ;;  %s2951_s8 = sld [smem:[#allocation26_spill]] }
  0xdb   : > { %v1890_v10 = vpack.c.bf16 %v476_v9, %v475_v8  ;;  %v478_v12 = vld [vmem:[#allocation7 + $0x38] sm:$0xff]  ;;  %v479_v14 = vld [vmem:[#allocation7 + $0x40] sm:$0xff]  ;;  %v480_v15 = vld [vmem:[#allocation7 + $0x48] sm:$0xff]  ;;  %s1381_s20 = sshll.u32 %s468_s10, 4  ;;  %s1369_s26 = scalar_lea.sflag [#allocation4], %s2723_s25  ;;  %s2865_s20 = int_to_ptr.vmem [resolvable:$true] %s1381_s20 }
  0xdc   : > { %1885 = vmatpush3.bf16.msra.mxu0 %v1884_v5  ;;  %v1893_v13 = vpack.c.bf16 %v478_v12, %v477_v11  ;;  %v1896_v16 = vpack.c.bf16 %v480_v15, %v479_v14  ;;  %v481_v17 = vld [vmem:[#allocation7 + $0x50] sm:$0xff]  ;;  %v482_v18 = vld [vmem:[#allocation7 + $0x58] sm:$0xff]  ;;  %v483_v20 = vld [vmem:[#allocation7 + $0x60] sm:$0xff]  ;;  %s2314_s21 = scalar_lea.vmem %s2865_s20, 16  ;;  %p2952_p2 = scmp.ne.s32.totalorder %s2939_s27, 0 }
  0xdd   : > { %1886 = vmatprep.subr.bf16.mxu0 %v2406_v0  ;;  %v1899_v19 = vpack.c.bf16 %v482_v18, %v481_v17  ;;  %v484_v21 = vld [vmem:[#allocation7 + $0x68] sm:$0xff]  ;;  %v485_v23 = vld [vmem:[#allocation7 + $0x70] sm:$0xff]  ;;  %v486_v24 = vld [vmem:[#allocation7 + $0x78] sm:$0xff]  ;;  %p2315_p0 = scmp.ne.s32.totalorder %s2865_s20, %s2314_s21 }
  0xde   : > { %v1902_v22 = vpack.c.bf16 %v484_v21, %v483_v20  ;;  %v1905_v25 = vpack.c.bf16 %v486_v24, %v485_v23  ;;  %v469_v26 = vld [vmem:[%s2727_s2] sm:$0xff]  ;;  %v646_v29 = vld [vmem:[#allocation8 + $0x10] sm:$0xff]  ;;  %v647_v31 = vld [vmem:[#allocation8 + $0x18] sm:$0xff]  ;;  %s1540_s2 = sshll.u32 %s2486_s19, 4  ;;  %s2409_s19 = smov [#allocation13]  }
  0xdf   : > { %v644_v27 = vld [vmem:[#allocation8] sm:$0xff]  ;;  %v645_v28 = vld [vmem:[#allocation8 + $0x8] sm:$0xff]  ;;  %v1911_v32 = vpack.c.bf16 %v647_v31, %v646_v29  ;;  %v650_v36 = vld [vmem:[#allocation8 + $0x30] sm:$0xff]  ;;  %p2316_p9 = pnand %p2315_p0, %p2952_p2  ;;  %s2318_s28 = sshll.u32 %s2409_s19, 4  ;;  %s2319_s28 = int_to_ptr.vmem [resolvable:$false] %s2318_s28 }
  0xe0   : > { %1888 = vmatpush3.bf16.msra.mxu0 %v1887_v7  ;;  %v1908_v30 = vpack.c.bf16 %v645_v28, %v644_v27  ;;  %v648_v33 = vld [vmem:[#allocation8 + $0x20] sm:$0xff]  ;;  %v649_v34 = vld [vmem:[#allocation8 + $0x28] sm:$0xff]  ;;  %v651_v37 = vld [vmem:[#allocation8 + $0x38] sm:$0xff]  ;;  %s2863_s30 = scalar_lea.hbm %s2951_s8, %s1540_s2  ;;  %s2320_s29 = scalar_lea.vmem %s2319_s28, 32 }
  0xe1   : > { %1889 = vmatprep.subr.bf16.mxu0 %v2406_v0  ;;  %v1914_v35 = vpack.c.bf16 %v649_v34, %v648_v33  ;;  %v1917_v38 = vpack.c.bf16 %v651_v37, %v650_v36  ;;  %v652_v39 = vld [vmem:[#allocation8 + $0x40] sm:$0xff]  ;;  %v653_v40 = vld [vmem:[#allocation8 + $0x48] sm:$0xff]  ;;  %v654_v42 = vld [vmem:[#allocation8 + $0x50] sm:$0xff]  ;;  %p2317_p10 = pneg %p2316_p9  ;;  %p2321_p4 = scmp.lt.s32.totalorder %s2865_s20, %s2319_s28 }
  0xe2   : > { %1909 = vmatpush3.bf16.msra.mxu1 %v1908_v30  ;;  %v1920_v41 = vpack.c.bf16 %v653_v40, %v652_v39  ;;  %v655_v43 = vld [vmem:[#allocation8 + $0x58] sm:$0xff]  ;;  %v656_v45 = vld [vmem:[#allocation8 + $0x60] sm:$0xff]  ;;  %v657_v46 = vld [vmem:[#allocation8 + $0x68] sm:$0xff]  ;;  %p2322_p6 = scmp.lt.s32.totalorder %s2320_s29, %s2314_s21 }
  0xe3   : > { %1910 = vmatprep.subr.bf16.mxu1 %v2406_v0  ;;  %v1923_v44 = vpack.c.bf16 %v655_v43, %v654_v42  ;;  %v1926_v47 = vpack.c.bf16 %v657_v46, %v656_v45  ;;  %v658_v48 = vld [vmem:[#allocation8 + $0x70] sm:$0xff]  ;;  %v659_v49 = vld [vmem:[#allocation8 + $0x78] sm:$0xff]  ;;  %v1526_v51 = vld [vmem:[%s2909_s3] ss:$0 sm:$0xff] }
  0xe4   : > { %1891 = vmatpush3.bf16.msra.mxu0 %v1890_v10  ;;  %v1929_v50 = vpack.c.bf16 %v659_v49, %v658_v48  ;;  %v2781_v55 = vld [vmem:[%s2734_s22] sm:$0xff]  ;;  %v743_v56 = vld [vmem:[#allocation10] sm:$0xff]  ;;  %v744_v57 = vld [vmem:[#allocation10 + $0x8] sm:$0xff]  ;;  %p2323_p7 = por %p2322_p6, %p2321_p4 }
  0xe5   : > { %1892 = vmatprep.subr.bf16.mxu0 %v2406_v0  ;;  %v745_v58 = vld [vmem:[#allocation10 + $0x10] sm:$0xff]  ;;  %v1932_v59 = vpack.c.bf16 %v744_v57, %v743_v56  ;;  %v746_v60 = vld [vmem:[#allocation10 + $0x18] sm:$0xff]  ;;  %v747_v62 = vld [vmem:[#allocation10 + $0x20] sm:$0xff] }
  0xe6   : > { %1912 = vmatpush3.bf16.msra.mxu1 %v1911_v32  ;;  %v1935_v61 = vpack.c.bf16 %v746_v60, %v745_v58  ;;  %v748_v63 = vld [vmem:[#allocation10 + $0x28] sm:$0xff]  ;;  %v749_v5 = vld [vmem:[#allocation10 + $0x30] sm:$0xff]  ;;  %v750_v6 = vld [vmem:[#allocation10 + $0x38] sm:$0xff]  ;;  %p2324_p5 = pnand %p2323_p7, %p2317_p10 }
  0xe7   : > { %1913 = vmatprep.subr.bf16.mxu1 %v2406_v0  ;;  %v1938_v2 = vpack.c.bf16 %v748_v63, %v747_v62  ;;  %v1941_v7 = vpack.c.bf16 %v750_v6, %v749_v5  ;;  %v751_v8 = vld [vmem:[#allocation10 + $0x40] sm:$0xff]  ;;  %v752_v9 = vld [vmem:[#allocation10 + $0x48] sm:$0xff]  ;;  %v753_v11 = vld [vmem:[#allocation10 + $0x50] sm:$0xff] }
  0xe8   : > { %1894 = vmatpush3.bf16.msra.mxu0 %v1893_v13  ;;  %v1944_v10 = vpack.c.bf16 %v752_v9, %v751_v8  ;;  %v754_v12 = vld [vmem:[#allocation10 + $0x58] sm:$0xff]  ;;  %v755_v14 = vld [vmem:[#allocation10 + $0x60] sm:$0xff]  ;;  %v756_v15 = vld [vmem:[#allocation10 + $0x68] sm:$0xff] }
  0xe9   : > { %1895 = vmatprep.subr.bf16.mxu0 %v2406_v0  ;;  %v1947_v13 = vpack.c.bf16 %v754_v12, %v753_v11  ;;  %v757_v17 = vld [vmem:[#allocation10 + $0x70] sm:$0xff]  ;;  %v758_v18 = vld [vmem:[#allocation10 + $0x78] sm:$0xff]  ;;  %v917_v20 = vld [vmem:[#allocation8 + $0x80] sm:$0xff] }
  0xea   : > { %1915 = vmatpush3.bf16.msra.mxu1 %v1914_v35  ;;  %v918_v21 = vld [vmem:[#allocation8 + $0x88] sm:$0xff]  ;;  %v920_v24 = vld [vmem:[#allocation8 + $0x98] sm:$0xff]  ;;  %v923_v29 = vld [vmem:[#allocation8 + $0xb0] sm:$0xff] }
  0xeb   : > { %1916 = vmatprep.subr.bf16.mxu1 %v2406_v0  ;;  %v1956_v23 = vpack.c.bf16 %v918_v21, %v917_v20  ;;  %v922_v27 = vld [vmem:[#allocation8 + $0xa8] sm:$0xff]  ;;  %v924_v30 = vld [vmem:[#allocation8 + $0xb8] sm:$0xff]  ;;  %v925_v32 = vld [vmem:[#allocation8 + $0xc0] sm:$0xff] }
  0xec   : > { %1897 = vmatpush3.bf16.msra.mxu0 %v1896_v16  ;;  %v1950_v16 = vpack.c.bf16 %v756_v15, %v755_v14  ;;  %v1965_v31 = vpack.c.bf16 %v924_v30, %v923_v29  ;;  %v926_v33 = vld [vmem:[#allocation8 + $0xc8] sm:$0xff]  ;;  %v927_v35 = vld [vmem:[#allocation8 + $0xd0] sm:$0xff]  ;;  %v928_v36 = vld [vmem:[#allocation8 + $0xd8] sm:$0xff] }
  0xed   : > { %1898 = vmatprep.subr.bf16.mxu0 %v2406_v0  ;;  %v1968_v34 = vpack.c.bf16 %v926_v33, %v925_v32  ;;  %v1971_v37 = vpack.c.bf16 %v928_v36, %v927_v35  ;;  %v930_v39 = vld [vmem:[#allocation8 + $0xe8] sm:$0xff]  ;;  %v1020_v56 = vld [vmem:[#allocation10 + $0x90] sm:$0xff]  ;;  %v1021_v58 = vld [vmem:[#allocation10 + $0x98] sm:$0xff] }
  0xee   : > { %1918 = vmatpush3.bf16.msra.mxu1 %v1917_v38  ;;  %v929_v38 = vld [vmem:[#allocation8 + $0xe0] sm:$0xff]  ;;  %v1025_v5 = vld [vmem:[#allocation10 + $0xb8] sm:$0xff]  ;;  %v1027_v8 = vld [vmem:[#allocation10 + $0xc8] sm:$0xff] }
  0xef   : > { %1919 = vmatprep.subr.bf16.mxu1 %v2406_v0  ;;  %v1974_v40 = vpack.c.bf16 %v930_v39, %v929_v38  ;;  %v1022_v60 = vld [vmem:[#allocation10 + $0xa0] sm:$0xff]  ;;  %v1029_v11 = vld [vmem:[#allocation10 + $0xd8] sm:$0xff]  ;;  %v1031_v14 = vld [vmem:[#allocation10 + $0xe8] sm:$0xff] }
  0xf0   : > { %1900 = vmatpush3.bf16.msra.mxu0 %v1899_v19  ;;  %v1953_v19 = vpack.c.bf16 %v758_v18, %v757_v17  ;;  %v1033_v17 = vld [vmem:[#allocation10 + $0xf8] sm:$0xff]  ;;  %v1537_v29 = vld [vmem:[%s2913_s7 + $0x1] ss:$0 sm:$0xff] }
  0xf1   : > { %1901 = vmatprep.subr.bf16.mxu0 %v2406_v0 }
  0xf2   : > { %1921 = vmatpush3.bf16.msra.mxu1 %v1920_v41  ;;  %v1529_v41 = vld [vmem:[%s2911_s5] ss:$0 sm:$0xff] }
  0xf3   : > { %1922 = vmatprep.subr.bf16.mxu1 %v2406_v0 }
  0xf4   : > { %1903 = vmatpush3.bf16.msra.mxu0 %v1902_v22  ;;  %v919_v22 = vld [vmem:[#allocation8 + $0x90] sm:$0xff] }
  0xf5   : > { %1904 = vmatprep.subr.bf16.mxu0 %v2406_v0 }
  0xf6   : > { %1924 = vmatpush3.bf16.msra.mxu1 %v1923_v44 }
  0xf7   : > { %1925 = vmatprep.subr.bf16.mxu1 %v2406_v0 }
  0xf8   : > { %1906 = vmatpush3.bf16.msra.mxu0 %v1905_v25  ;;  %v1959_v25 = vpack.c.bf16 %v920_v24, %v919_v22 }
  0xf9   : > { %1688 = vmatprep.subr.mxu0 %v2408_v1 }
  0xfa   : > { %1927 = vmatpush3.bf16.msra.mxu1 %v1926_v47 }
  0xfb   : > { %1686 = vmatmul.mubr.f32.vlgmr.msra.gmra.mrb[0].mxu0 %v469_v26  ;;  %1928 = vmatprep.subr.bf16.mxu1 %v2406_v0  ;;  %v921_v26 = vld [vmem:[#allocation8 + $0xa0] sm:$0xff] }
  0xfc   : > { %1690 = vmatprep.mubr.msk.f32.mxu0 %vm2407_vm0, %v2408_v1  ;;  %v1962_v28 = vpack.c.bf16 %v922_v27, %v921_v26 }
  0xfe   : > { %1930 = vmatpush3.bf16.msra.mxu1 %v1929_v50  ;;  %v931_v50 = vld [vmem:[#allocation8 + $0xf0] sm:$0xff] }
  0xff   : > { %1955 = vmatprep.subr.bf16.mxu1 %v2406_v0 }
 0x1ce   : > { %v560_v52 = vpop.f32.mrb[0].mxu0 }
 0x1cf   : > { %v561_v53 = vadd.f32 %v1526_v51, %v560_v52  ;;  %v1687_v54 = vpop.f32.mrb[1].mxu0  ;;  %v932_v51 = vld [vmem:[#allocation8 + $0xf8] sm:$0xff] }
 0x1d0   : > { %v1977_v52 = vpack.c.bf16 %v932_v51, %v931_v50  ;;  %v1019_v54 = vld [vmem:[#allocation10 + $0x88] sm:$0xff] }
 0x1d1   : > { %1689 = vmatpush3.msra.mxu0 %v561_v53  ;;  %v1018_v53 = vld [vmem:[#allocation10 + $0x80] sm:$0xff] }
 0x1d2   : > { %1691 = vmatmul.mubr.msk.f32.vlgmr.msra.gmra.mrb[2].mxu0 %vm570_vm1, %v2781_v55  ;;  %1931 = vmatprep.subr.bf16.mxu0 %v2406_v0  ;;  %v1980_v57 = vpack.c.bf16 %v1019_v54, %v1018_v53  ;;  %v1265_v53 = vld [vmem:[#allocation11] sm:$0xff]  ;;  %v1266_v54 = vld [vmem:[#allocation11 + $0x8] sm:$0xff] }
 0x1d3   : > { %1760 = vmatprep.mubr.msk.f32.mxu0 %vm2407_vm0, %v2408_v1  ;;  %1933 = vmatpush3.bf16.msra.mxu0 %v1932_v59  ;;  %v1983_v59 = vpack.c.bf16 %v1021_v58, %v1020_v56  ;;  %v2004_v56 = vpack.c.bf16 %v1266_v54, %v1265_v53  ;;  %v1268_v58 = vld [vmem:[#allocation11 + $0x18] sm:$0xff] }
 0x1d4   : > { %1934 = vmatprep.subr.bf16.mxu0 %v2406_v0 }
 0x1d7   : > { %1936 = vmatpush3.bf16.msra.mxu0 %v1935_v61 }
 0x1d8   : > { %1937 = vmatprep.subr.bf16.mxu0 %v2406_v0 }
 0x1db   : > { %1939 = vmatpush3.bf16.msra.mxu0 %v1938_v2 }
 0x1dc   : > { %1940 = vmatprep.subr.bf16.mxu0 %v2406_v0 }
 0x1df   : > { %1942 = vmatpush3.bf16.msra.mxu0 %v1941_v7  ;;  %v1026_v7 = vld [vmem:[#allocation10 + $0xc0] sm:$0xff] }
 0x1e0   : > { %1943 = vmatprep.subr.bf16.mxu0 %v2406_v0  ;;  %v1992_v9 = vpack.c.bf16 %v1027_v8, %v1026_v7  ;;  %v1277_v8 = vld [vmem:[#allocation11 + $0x60] sm:$0xff] }
 0x1e3   : > { %1945 = vmatpush3.bf16.msra.mxu0 %v1944_v10  ;;  %v1028_v10 = vld [vmem:[#allocation10 + $0xd0] sm:$0xff] }
 0x1e4   : > { %1946 = vmatprep.subr.bf16.mxu0 %v2406_v0  ;;  %v1995_v12 = vpack.c.bf16 %v1029_v11, %v1028_v10  ;;  %v1279_v11 = vld [vmem:[#allocation11 + $0x70] sm:$0xff] }
 0x1e7   : > { %1948 = vmatpush3.bf16.msra.mxu0 %v1947_v13  ;;  %v1030_v13 = vld [vmem:[#allocation10 + $0xe0] sm:$0xff] }
 0x1e8   : > { %1949 = vmatprep.subr.bf16.mxu0 %v2406_v0  ;;  %v1998_v15 = vpack.c.bf16 %v1031_v14, %v1030_v13 }
 0x1eb   : > { %1951 = vmatpush3.bf16.msra.mxu0 %v1950_v16  ;;  %v1032_v16 = vld [vmem:[#allocation10 + $0xf0] sm:$0xff] }
 0x1ec   : > { %1952 = vmatprep.subr.bf16.mxu0 %v2406_v0  ;;  %v2001_v18 = vpack.c.bf16 %v1033_v17, %v1032_v16  ;;  %v1281_v16 = vld [vmem:[%s2950_s9] sm:$0x1] }
 0x1ef   : > { %1954 = vmatpush3.bf16.msra.mxu0 %v1953_v19  ;;  %v1534_v19 = vld [vmem:[%s2911_s5 + $0x1] ss:$0 sm:$0xff] }
 0x1f0   : > { %1763 = vmatprep.subr.mxu0 %v2408_v1 }
 0x2a5   : > { %v640_v3 = vpop.f32.mrb[2].mxu0 }
 0x2a6   : > { %v1692_v4 = vpop.f32.mrb[3].mxu0  ;;  %1726 = vmatmul.mubr.f32.vlgmr.msra.gmra.mrb[0].mxu1 %v640_v3 }
 0x2a7   : > { %1800 = vmatprep.mubr.msk.f32.mxu1 %vm2407_vm0, %v2408_v1  ;;  %1957 = vmatpush3.bf16.msra.mxu1 %v1956_v23  ;;  %v1024_v4 = vld [vmem:[#allocation10 + $0xb0] sm:$0xff] }
 0x2a8   : > { %1958 = vmatprep.subr.bf16.mxu1 %v2406_v0  ;;  %v1989_v6 = vpack.c.bf16 %v1025_v5, %v1024_v4  ;;  %v1274_v4 = vld [vmem:[#allocation11 + $0x48] sm:$0xff] }
 0x2ab   : > { %1960 = vmatpush3.bf16.msra.mxu1 %v1959_v25 }
 0x2ac   : > { %1961 = vmatprep.subr.bf16.mxu1 %v2406_v0 }
 0x2af   : > { %1963 = vmatpush3.bf16.msra.mxu1 %v1962_v28  ;;  %v564_v28 = vlaneseq }
 0x2b0   : > { %1964 = vmatprep.subr.bf16.mxu1 %v2406_v0 }
 0x2b1   : > { %v2831_v30 = vand.u32 127, %v564_v28 }
 0x2b3   : > { %1966 = vmatpush3.bf16.msra.mxu1 %v1965_v31  ;;  %v1531_v31 = vld [vmem:[%s2913_s7] ss:$0 sm:$0xff]  ;;  %vm566_vm4 = vcmp.lt.s32.totalorder %v2831_v30, 16  ;;  %vm567_vm5 = vcmp.lt.s32.totalorder %v2831_v30, 8  ;;  %vm1352_vm6 = vcmp.lt.s32.totalorder %v2831_v30, 4 }
 0x2b4   : > { %1967 = vmatprep.subr.bf16.mxu1 %v2406_v0  ;;  %v1527_v50 = vsel %vm567_vm5, 1.0, %v2408_v1 }
 0x2b7   : > { %1969 = vmatpush3.bf16.msra.mxu1 %v1968_v34 }
 0x2b8   : > { %1970 = vmatprep.subr.bf16.mxu1 %v2406_v0 }
 0x2bb   : > { %1972 = vmatpush3.bf16.msra.mxu1 %v1971_v37 }
 0x2bc   : > { %1973 = vmatprep.subr.bf16.mxu1 %v2406_v0 }
 0x2bf   : > { %1975 = vmatpush3.bf16.msra.mxu1 %v1974_v40 }
 0x2c0   : > { %1976 = vmatprep.subr.bf16.mxu1 %v2406_v0 }
 0x2c3   : > { %1978 = vmatpush3.bf16.msra.mxu1 %v1977_v52 }
 0x2c4   : > { %1838 = vmatprep.subr.mxu1 %v2408_v1 }
 0x379   : > { %v733_v42 = vpop.f32.mrb[0].mxu1 }
 0x37a   : > { %v734_v43 = vadd.f32 %v1529_v41, %v733_v42  ;;  %v1727_v44 = vpop.f32.mrb[1].mxu1 }
 0x37c   : > { %v738_v45 = vmin.f32 %v734_v43, 0.0  ;;  %vm737_vm2 = vcmp.gt.f32.partialorder %v734_v43, 0.0 }
 0x37e   : > { %v739_v46 = vmul.f32 1.442695, %v738_v45 }
 0x380   : > { %2126 = vpow2.f32 %v739_v46 }
 0x38a   : > { %v2127_v47 = vpop.eup %2126 }
 0x38b   : > { %v1530_v48 = vadd.f32 -1.0, %v2127_v47 }
 0x38d   : > { %v742_v49 = vsel %vm737_vm2, %v734_v43, %v1530_v48 }
 0x38e   : > { %1761 = vmatmul.mubr.f32.vlgmr.msra.gmra.mrb[4].mxu0 %v742_v49 }
 0x38f   : > { %1764 = vmatpush3.msra.mxu0 %v742_v49  ;;  %1765 = vmatprep.mubr.msk.f32.mxu0 %vm2407_vm0, %v2408_v1 }
 0x390   : > { %1979 = vmatprep.subr.bf16.mxu0 %v2406_v0 }
 0x392   : > { %1766 = vmatmul.mubr.msk.f32.vlgmr.msra.gmra.mrb[6].mxu0 %vm570_vm1, %v2781_v55  ;;  %v1023_v55 = vld [vmem:[#allocation10 + $0xa8] sm:$0xff] }
 0x393   : > { %1835 = vmatprep.mubr.msk.f32.mxu0 %vm2407_vm0, %v2408_v1  ;;  %1981 = vmatpush3.bf16.msra.mxu0 %v1980_v57  ;;  %v1986_v61 = vpack.c.bf16 %v1023_v55, %v1022_v60  ;;  %v1267_v57 = vld [vmem:[#allocation11 + $0x10] sm:$0xff]  ;;  %v1269_v60 = vld [vmem:[#allocation11 + $0x20] sm:$0xff]  ;;  %v1270_v55 = vld [vmem:[#allocation11 + $0x28] sm:$0xff] }
 0x394   : > { %1982 = vmatprep.subr.bf16.mxu0 %v2406_v0 }
 0x397   : > { %1984 = vmatpush3.bf16.msra.mxu0 %v1983_v59  ;;  %v2007_v59 = vpack.c.bf16 %v1268_v58, %v1267_v57 }
 0x398   : > { %1985 = vmatprep.subr.bf16.mxu0 %v2406_v0 }
 0x39b   : > { %1987 = vmatpush3.bf16.msra.mxu0 %v1986_v61  ;;  %v2010_v61 = vpack.c.bf16 %v1270_v55, %v1269_v60 }
 0x39c   : > { %1988 = vmatprep.subr.bf16.mxu0 %v2406_v0 }
 0x39f   : > { %1990 = vmatpush3.bf16.msra.mxu0 %v1989_v6  ;;  %v1276_v6 = vld [vmem:[#allocation11 + $0x58] sm:$0xff] }
 0x3a0   : > { %1991 = vmatprep.subr.bf16.mxu0 %v2406_v0 }
 0x3a3   : > { %1993 = vmatpush3.bf16.msra.mxu0 %v1992_v9  ;;  %v1278_v9 = vld [vmem:[#allocation11 + $0x68] sm:$0xff] }
 0x3a4   : > { %1994 = vmatprep.subr.bf16.mxu0 %v2406_v0  ;;  %v2022_v10 = vpack.c.bf16 %v1278_v9, %v1277_v8 }
 0x3a7   : > { %1996 = vmatpush3.bf16.msra.mxu0 %v1995_v12  ;;  %v1280_v12 = vld [vmem:[#allocation11 + $0x78] sm:$0xff] }
 0x3a8   : > { %1997 = vmatprep.subr.bf16.mxu0 %v2406_v0  ;;  %v2025_v13 = vpack.c.bf16 %v1280_v12, %v1279_v11 }
 0x3ab   : > { %1999 = vmatpush3.bf16.msra.mxu0 %v1998_v15 }
 0x3ac   : > { %2000 = vmatprep.subr.bf16.mxu0 %v2406_v0 }
 0x3af   : > { %2002 = vmatpush3.bf16.msra.mxu0 %v2001_v18 }
 0x461   : > { %v832_v62 = vpop.f32.mrb[4].mxu0 }
 0x462   : > { %v1762_v63 = vpop.f32.mrb[5].mxu0  ;;  %v833_v35 = vadd.f32 %v1531_v31, %v832_v62  ;;  %v1271_v62 = vld [vmem:[#allocation11 + $0x30] sm:$0xff] }
 0x463   : > { %v1272_v63 = vld [vmem:[#allocation11 + $0x38] sm:$0xff] }
 0x464   : > { %v836_v37 = vsel %vm566_vm4, %v833_v35, -1e+30 }
 0x465   : > { %v912_v2 = vpop.f32.mrb[6].mxu0 }
 0x466   : > { %v1767_v3 = vpop.f32.mrb[7].mxu0  ;;  %1801 = vmatmul.mubr.f32.vlgmr.msra.gmra.mrb[2].mxu1 %v912_v2  ;;  %v2013_v2 = vpack.c.bf16 %v1272_v63, %v1271_v62 }
 0x467   : > { %1840 = vmatprep.mubr.msk.f32.mxu1 %vm2407_vm0, %v2408_v1  ;;  %v1273_v3 = vld [vmem:[#allocation11 + $0x40] sm:$0xff] }
 0x468   : > { %v2016_v5 = vpack.c.bf16 %v1274_v4, %v1273_v3 }
 0x539   : > { %v1007_v20 = vpop.f32.mrb[2].mxu1 }
 0x53a   : > { %v1008_v21 = vadd.f32 %v1534_v19, %v1007_v20  ;;  %v1802_v22 = vpop.f32.mrb[3].mxu1 }
 0x53c   : > { %v1012_v23 = vmin.f32 %v1008_v21, 0.0  ;;  %vm1011_vm3 = vcmp.gt.f32.partialorder %v1008_v21, 0.0 }
 0x53e   : > { %v1013_v24 = vmul.f32 1.442695, %v1012_v23 }
 0x540   : > { %2128 = vpow2.f32 %v1013_v24 }
 0x54a   : > { %v2129_v25 = vpop.eup %2128 }
 0x54b   : > { %v1535_v26 = vadd.f32 -1.0, %v2129_v25 }
 0x54d   : > { %v1016_v27 = vsel %vm1011_vm3, %v1008_v21, %v1535_v26 }
 0x54e   : > { %1836 = vmatmul.mubr.f32.vlgmr.msra.gmra.mrb[8].mxu0 %v1016_v27 }
 0x621   : > { %v1108_v32 = vpop.f32.mrb[8].mxu0 }
 0x622   : > { %v1109_v33 = vadd.f32 %v1537_v29, %v1108_v32  ;;  %v1837_v34 = vpop.f32.mrb[9].mxu0 }
 0x624   : > { %v1112_v36 = vsel %vm566_vm4, %v1109_v33, -1e+30 }
 0x625   : > { %1113 = vmax.xlane.f32.xlu0 %v1112_v36 }
 0x629   : > { %837 = vmax.xlane.f32.xlu0 %v836_v37 }
 0x6b2   : > { %v1114_v38 = vpop.xlane.xlu0 %1113 }
 0x6b3   : > { %v1115_v39 = vsub.f32 %v1112_v36, %v1114_v38 }
 0x6b5   : > { %v1116_v40 = vmul.f32 1.442695, %v1115_v39 }
 0x6b6   : > { %v838_v41 = vpop.xlane.xlu0 %837 }
 0x6b7   : > { %2130 = vpow2.f32 %v1116_v40  ;;  %v839_v42 = vsub.f32 %v836_v37, %v838_v41 }
 0x6b9   : > { %v840_v43 = vmul.f32 1.442695, %v839_v42 }
 0x6bb   : > { %2132 = vpow2.f32 %v840_v43 }
 0x6c1   : > { %v2131_v44 = vpop.eup %2130 }
 0x6c2   : > { %1118 = vadd.xlane.f32.xlu1 %v2131_v44 }
 0x6c5   : > { %v2133_v45 = vpop.eup %2132 }
 0x6c6   : > { %842 = vadd.xlane.f32.xlu1 %v2133_v45 }
 0x74f   : > { %v1119_v46 = vpop.xlane.xlu1 %1118 }
 0x750   : > { %2134 = vrcp.f32 %v1119_v46 }
 0x753   : > { %v843_v47 = vpop.xlane.xlu1 %842 }
 0x754   : > { %2136 = vrcp.f32 %v843_v47 }
 0x75a   : > { %v2135_v48 = vpop.eup %2134 }
 0x75b   : > { %v1121_v49 = vmul.f32 %v2135_v48, %v2131_v44 }
 0x75d   : > { %1839 = vmatpush3.msra.mxu1 %v1121_v49 }
 0x75e   : > { %v2137_v51 = vpop.eup %2136  ;;  %1841 = vmatmul.mubr.msk.f32.vlgmr.msra.gmra.mrb[4].mxu1 %vm570_vm1, %v1527_v50  ;;  %1843 = vmatprep.subr.mxu1 %v2408_v1 }
 0x75f   : > { %v845_v52 = vmul.f32 %v2137_v51, %v2133_v45  ;;  %1845 = vmatprep.mubr.msk.f32.mxu1 %vm2407_vm0, %v2408_v1 }
 0x761   : > { %1844 = vmatpush3.msra.mxu1 %v845_v52 }
 0x762   : > { %2003 = vmatprep.subr.bf16.mxu1 %v2406_v0 }
 0x766   : > { %1846 = vmatmul.mubr.msk.f32.vlgmr.msra.gmra.mrb[4].mxu1 %vm570_vm1, %v1527_v50 }
 0x767   : > { %2005 = vmatpush3.bf16.msra.mxu1 %v2004_v56  ;;  %1880 = vmatprep.mubr.msk.f32.mxu1 %vm2407_vm0, %v2408_v1  ;;  %v1275_v1 = vld [vmem:[#allocation11 + $0x50] sm:$0xff] }
 0x768   : > { %2006 = vmatprep.subr.bf16.mxu1 %v2406_v0  ;;  %v2019_v7 = vpack.c.bf16 %v1276_v6, %v1275_v1 }
 0x76b   : > { %2008 = vmatpush3.bf16.msra.mxu1 %v2007_v59 }
 0x76c   : > { %2009 = vmatprep.subr.bf16.mxu1 %v2406_v0 }
 0x76f   : > { %2011 = vmatpush3.bf16.msra.mxu1 %v2010_v61 }
 0x770   : > { %2012 = vmatprep.subr.bf16.mxu1 %v2406_v0 }
 0x773   : > { %2014 = vmatpush3.bf16.msra.mxu1 %v2013_v2 }
 0x774   : > { %2015 = vmatprep.subr.bf16.mxu1 %v2406_v0 }
 0x777   : > { %2017 = vmatpush3.bf16.msra.mxu1 %v2016_v5 }
 0x778   : > { %2018 = vmatprep.subr.bf16.mxu1 %v2406_v0 }
 0x77b   : > { %2020 = vmatpush3.bf16.msra.mxu1 %v2019_v7 }
 0x77c   : > { %2021 = vmatprep.subr.bf16.mxu1 %v2406_v0 }
 0x77f   : > { %2023 = vmatpush3.bf16.msra.mxu1 %v2022_v10 }
 0x780   : > { %2024 = vmatprep.subr.bf16.mxu1 %v2406_v0 }
 0x783   : > { %2026 = vmatpush3.bf16.msra.mxu1 %v2025_v13 }
 0x839   : > { %v1261_v14 = vpop.f32.mrb[4].mxu1 }
 0x83a   : > { %v1847_v15 = vpop.f32.mrb[5].mxu1  ;;  %1881 = vmatmul.mubr.f32.vlgmr.msra.gmra.mrb[6].mxu1 %v1261_v14 }
 0x90d   : > { %v1348_v17 = vpop.f32.mrb[6].mxu1 }
 0x90e   : > { %v1349_v18 = vadd.f32 %v1348_v17, %v1281_v16  ;;  %v1882_v19 = vpop.f32.mrb[7].mxu1 }
 0x910   : > { %v1353_v20 = vsel %vm1352_vm6, %v1349_v18, -1e+30 }
 0x911   : > { %v1355_v21 = vsel %vm1354_vm7, %v1353_v20, -inf }
 0x912   : > { %1356 = vmax.xlane.f32.xlu0 %v1355_v21 }
 0x99f   : > { %v1357_v0 = vpop.xlane.xlu0 %1356 }
 0x9a0   : > { %v1358_v22 = vsub.f32 %v1353_v20, %v1357_v0 }
 0x9a2   : > { %v1359_v23 = vmul.f32 1.442695, %v1358_v22 }
 0x9a4   : > { %2138 = vpow2.f32 %v1359_v23 }
 0x9ae   : > { %v2139_v24 = vpop.eup %2138 }
 0x9af   : > { %v1361_v25 = vsel %vm1354_vm7, %v2139_v24, 0.0 }
 0x9b0   : > { %1362 = vadd.xlane.f32.xlu1 %v1361_v25 }
 0xa3d   : > { %v1363_v26 = vpop.xlane.xlu1 %1362 }
 0xa3e   : > { %2140 = vlog2.f32 %v1363_v26 }
 0xa48   : > { %v2141_v27 = vpop.eup %2140 }
 0xa49   : > { %v1365_v28 = vmul.f32 0.6931472, %v2141_v27 }
 0xa4b   : > { %v1366_v29 = vsub.f32 %v1358_v22, %v1365_v28 }
 0xa4d   : > { %1367 = vst [vmem:[%s468_s10] sm:$0x1] %v1366_v29 }
 0xa4e   : > { %2327 = shalt.err (!%p2324_p5)
}
 0xa4f   : > { %s2328_s25 = scalar_lea.hbm %s2863_s30, 16  ;;  %s2332_s18 = scalar_lea.hbm %s2951_s8, 64 }
 0xa50   : > { %p2329_p11 = scmp.ne.s32.totalorder %s2863_s30, %s2328_s25  ;;  %p2333_p12 = scmp.lt.u32.totalorder %s2863_s30, %s2951_s8 }
 0xa51   : > { %p2334_p3 = scmp.lt.u32.totalorder %s2332_s18, %s2328_s25  ;;  %p2336_p0 = scmp.lt.u32.totalorder %s2328_s25, %s2863_s30 }
 0xa52   : > { %p2330_p1 = pnand %p2329_p11, %p2952_p2 }
 0xa53   : > { %p2335_p13 = por %p2334_p3, %p2333_p12 }
 0xa54   : > { %p2331_p8 = pneg %p2330_p1 }
 0xa55   : > { %p2337_p9 = por %p2336_p0, %p2335_p13 }
 0xa57   : > { %p2338_p10 = pnand %p2337_p9, %p2331_p8 }
 0xa59   : > { %2341 = shalt.err (!%p2338_p10)
}
 0xa5a   : > { %2049 = dma.vmem_to_hbm [thread:$0]  (%p2952_p2), %s2865_s20, 16, %s2863_s30, %s1369_s26  }
 0xa5b PF: > { %p2084_p4 = scmp.ge.s32.totalorder %s2396_s16, 2  ;;  %s1393_s9 = sand.u32 1, %s2384_s13  }
 0xa5c   : > { %p2953_p6 = scmp.ne.s32.totalorder %s2940_s12, 0  ;;  %s1394_s2 = scalar_lea.sflag [#allocation4], %s1393_s9 }
 0xa5e   : > { %p2072_p7 = pnand %p2084_p4, %p2953_p6 }
 0xa60   : > { %2379 = dma.done.wait (!%p2072_p7), %s1394_s2, 16  }
 0xa61   : > { %2381 = vsyncadd (!%p2072_p7), %s1394_s2, 4294967280  ;;  %s2954_s10 = sld [smem:[#allocation20_spill]]  ;;  %p28_p5 = scmp.ge.s32.totalorder %s2616_s11, 6  }
 0xa62   : > { %s2955_s13 = smov %s2388_s14  ;;  %s2956_s14 = smov %s2392_s15 }
 0xa63   : > { %s2958_s16 = smov %s2616_s11  ;;  %30 = sbr.rel (!%p28_p5) target bundleno = 16 (0x10), region = 138 }
 0xa67   : > { %s2957_s15 = smov %s2954_s10 }
 0xa6a   :  { %1398 = vsyncpa [#allocation3], 1 }
 0xa6b   :  { %1400 = vsyncpa [#allocation3 + $0x1], 1 }
 0xa6c   :  { %1401 = vsyncpa [#allocation6], 1 }
 0xa6d   :  { %1403 = vsyncpa [#allocation6 + $0x1], 1 }
 0xa6e   :  { %1404 = vsyncpa [#allocation9], 1 }
 0xa6f   :  { %1405 = vsyncpa [#allocation12], 1 }
 0xa70   :  { %1406 = vsyncpa [#allocation4], 1 }
 0xa71   :  { %1408 = vsyncpa [#allocation4 + $0x1], 1 }

</bundles_post_ra>
